<compile_context>
chip_gen: v7x
topology: tpu7x:2x2x1
jax: 0.10.0
libtpu: 0.0.40
codegen_flags: <defaults>
</compile_context>

<pallas_src>
import math

import jax
import jax.numpy as jnp
from jax import lax
from jax.experimental import pallas as pl
from jax.experimental.pallas import tpu as pltpu


def _cdiv(a, b):
    return -(-a // b)


def _round_up(n, m):
    return ((n + m - 1) // m) * m


def _sublane_multiple(dtype):
    itemsize = jnp.dtype(dtype).itemsize
    if itemsize >= 4:
        return 8
    if itemsize == 2:
        return 16
    return 32


def _projection_head_kernel(x_ref, w_ref, b_ref, o_ref):
    # x_ref: (TB, D) VMEM, w_ref: (1, D) f32 VMEM (lane-major row),
    # b_ref: (1, 1) f32 SMEM scalar, o_ref: (TB, 1) VMEM.
    x = x_ref[...].astype(jnp.float32)
    w = w_ref[...]                      # (1, D) broadcasts over sublanes for free
    b = b_ref[0, 0]
    # fc: GEMV done on the VPU (elementwise mul) + XLU lane reduction -> no MXU.
    y = jnp.sum(x * w, axis=-1, keepdims=True) + b
    # exact GELU (PyTorch nn.GELU default): 0.5 * y * (1 + erf(y / sqrt(2)))
    inv_sqrt2 = jnp.float32(1.0 / math.sqrt(2.0))
    o_ref[...] = (0.5 * y * (1.0 + lax.erf(y * inv_sqrt2))).astype(o_ref.dtype)


def projection_head_forward(x, fc_w_row, fc_b, *, tb=2048):
    """Forward pass of ProjectionHead.

    x:        (B, D) f32/bf16
    fc_w_row: (1, D) f32   -- fc weight stored lane-major (one row)
    fc_b:     (1, 1) f32   -- fc bias (scalar)
    returns   (B, 1) in x.dtype
    """
    B, D = x.shape
    itemsize = jnp.dtype(x.dtype).itemsize
    sub = _sublane_multiple(x.dtype)

    # Cap the tile so one x buffer stays <= ~10 MiB (double-buffered -> <= 20 MiB,
    # comfortably inside v7x's 64 MiB VMEM and trivially inside v5e/v6e's 128 MiB).
    max_tile_bytes = 10 * 1024 * 1024
    tb_cap = max(sub, (max_tile_bytes // max(D * itemsize, 1)) // sub * sub)
    tb = min(tb, tb_cap)

    # Don't exceed the (sublane-rounded) batch; keep tb a sublane multiple.
    tb = max(sub, min(tb, _round_up(B, sub)))

    # Keep >= 4 grid steps when the batch is big enough, so both v7x TensorCores
    # get work (parallel axis) and each still double-buffers.
    while tb > sub and _cdiv(B, tb) < 4 and B > 4 * sub:
        tb = max(sub, (tb // 2) // sub * sub)

    grid = (_cdiv(B, tb),)

    # Explicit VMEM budget: 2x double-buffered x tile + padded (tb, 1) out tile
    # + slack, floored at 32 MiB (covers v5e's 16 MiB scoped default), capped at
    # 48 MiB (safe under v7x's 64 MiB per-TC physical VMEM).
    x_buf = tb * D * itemsize
    out_buf = tb * 128 * itemsize            # (tb, 1) block pads lanes to 128
    vmem_limit = 2 * (x_buf + out_buf) + (4 << 20)
    vmem_limit = int(min(max(vmem_limit, 32 << 20), 48 << 20))

    cost = pl.CostEstimate(
        flops=2 * B * D,
        transcendentals=B,                    # one erf per output element
        bytes_accessed=B * D * itemsize + D * 4 + 4 + B * itemsize,
    )

    return pl.pallas_call(
        _projection_head_kernel,
        out_shape=jax.ShapeDtypeStruct((B, 1), x.dtype),
        grid=grid,
        in_specs=[
            pl.BlockSpec((tb, D), lambda i: (i, 0)),          # streamed x tiles
            pl.BlockSpec((1, D), lambda i: (0, 0)),           # weight row: VMEM-resident
            pl.BlockSpec(memory_space=pltpu.MemorySpace.SMEM),  # bias scalar in SMEM
        ],
        out_specs=pl.BlockSpec((tb, 1), lambda i: (i, 0)),
        compiler_params=pltpu.CompilerParams(
            dimension_semantics=("parallel",),
            vmem_limit_bytes=vmem_limit,
        ),
        cost_estimate=cost,
    )(x, fc_w_row, fc_b)


def _torch_linear_init(key, out_features, in_features):
    """Deterministic init matching torch.nn.Linear default (uniform +-1/sqrt(fan_in))."""
    kw, kb = jax.random.split(key)
    bound = 1.0 / math.sqrt(in_features)
    w = jax.random.uniform(kw, (out_features, in_features), jnp.float32, -bound, bound)
    b = jax.random.uniform(kb, (out_features,), jnp.float32, -bound, bound)
    return w, b


def _gelu_ref(y):
    return 0.5 * y * (1.0 + lax.erf(y / jnp.sqrt(2.0).astype(jnp.float32)))


if __name__ == "__main__":
    key = jax.random.PRNGKey(0)
    k_x, k_fc, k_proj, k_x2 = jax.random.split(key, 4)

    batch = 2
    embedding_dim = 32  # small stand-in for config.text_embedding = 1024

    # Input: (batch, embedding_dim)
    x = jax.random.normal(k_x, (batch, embedding_dim), jnp.float32)

    # fc = LazyLinear(1) materialized as Linear(embedding_dim, 1)
    fc_w, fc_b = _torch_linear_init(k_fc, 1, embedding_dim)   # (1, D), (1,)
    fc_w_row = fc_w                                           # (1, D) lane-major row
    fc_b2 = fc_b.reshape(1, 1).astype(jnp.float32)            # (1, 1) scalar

    # self.projection = Linear(embedding_dim, 256) exists in __init__ but is
    # unused in forward; initialize for parity, never used.
    _proj_w, _proj_b = _torch_linear_init(k_proj, 256, embedding_dim)

    out = projection_head_forward(x, fc_w_row, fc_b2)
    out = jax.block_until_ready(out)

    # Reference in plain JAX (exact GELU)
    ref = _gelu_ref(x @ fc_w.T + fc_b2)
    assert out.shape == (batch, 1)
    assert jnp.allclose(out, ref, atol=1e-5, rtol=1e-5)

    # Secondary check: ragged batch + bf16 input (exercises dtype-aware tiling).
    x2 = jax.random.normal(k_x2, (5, embedding_dim), jnp.float32)
    out2 = jax.block_until_ready(
        projection_head_forward(x2.astype(jnp.bfloat16), fc_w_row, fc_b2)
    )
    ref2 = _gelu_ref(x2.astype(jnp.bfloat16).astype(jnp.float32) @ fc_w.T + fc_b2)
    assert out2.shape == (5, 1)
    assert jnp.allclose(out2.astype(jnp.float32), ref2, atol=2e-2, rtol=2e-2)

    print("KERNEL_OK")
</pallas_src>

<mosaic_0001>
module attributes {stable_mosaic.version = 11 : i64} {
  func.func @_projection_head_kernel(%arg0: i32, %arg1: memref<8x32xf32, #tpu.memory_space<vmem>>, %arg2: memref<1x32xf32, #tpu.memory_space<vmem>>, %arg3: memref<1x1xf32, #tpu.memory_space<smem>>, %arg4: memref<8x1xf32, #tpu.memory_space<vmem>>) attributes {dimension_semantics = [#tpu.dimension_semantics<parallel>], iteration_bounds = array<i64: 1>, scalar_prefetch = 0 : i64, scratch_operands = 0 : i64, tpu.core_type = #tpu.core_type<tc>, window_params = [{transform_indices = @transform_0, window_bounds = array<i64: 8, 32>}, {pipeline_mode = #tpu.pipeline_mode<synchronous>, transform_indices = @transform_1, window_bounds = array<i64: 1, 32>}, {transform_indices = @transform_2, window_bounds = array<i64: 1, 1>}, {transform_indices = @transform_3, window_bounds = array<i64: 8, 1>}]} {
    %c0 = arith.constant 0 : index
    %c0_0 = arith.constant 0 : index
    %0 = vector.load %arg1[%c0, %c0_0] : memref<8x32xf32, #tpu.memory_space<vmem>>, vector<8x32xf32>
    %c0_1 = arith.constant 0 : index
    %c0_2 = arith.constant 0 : index
    %1 = vector.load %arg2[%c0_1, %c0_2] : memref<1x32xf32, #tpu.memory_space<vmem>>, vector<1x32xf32>
    %c0_3 = arith.constant 0 : index
    %c0_4 = arith.constant 0 : index
    %2 = memref.load %arg3[%c0_3, %c0_4] : memref<1x1xf32, #tpu.memory_space<smem>>
    %3 = vector.broadcast %1 : vector<1x32xf32> to vector<8x32xf32>
    %4 = arith.mulf %0, %3 : vector<8x32xf32>
    %cst = arith.constant dense<0.000000e+00> : vector<8xf32>
    %5 = vector.multi_reduction <add>, %4, %cst [1] : vector<8x32xf32> to vector<8xf32>
    %6 = vector.shape_cast %5 : vector<8xf32> to vector<8x1xf32>
    %7 = vector.broadcast %2 : f32 to vector<8x1xf32>
    %8 = arith.addf %6, %7 : vector<8x1xf32>
    %cst_5 = arith.constant 5.000000e-01 : f32
    %9 = vector.broadcast %cst_5 : f32 to vector<8x1xf32>
    %10 = arith.mulf %9, %8 : vector<8x1xf32>
    %cst_6 = arith.constant 0.707106769 : f32
    %11 = vector.broadcast %cst_6 : f32 to vector<8x1xf32>
    %12 = arith.mulf %8, %11 : vector<8x1xf32>
    %13 = math.erf %12 : vector<8x1xf32>
    %cst_7 = arith.constant 1.000000e+00 : f32
    %14 = vector.broadcast %cst_7 : f32 to vector<8x1xf32>
    %15 = arith.addf %14, %13 : vector<8x1xf32>
    %16 = arith.mulf %10, %15 : vector<8x1xf32>
    %c0_8 = arith.constant 0 : index
    %c0_9 = arith.constant 0 : index
    %17 = vector.load %arg4[%c0_8, %c0_9] : memref<8x1xf32, #tpu.memory_space<vmem>>, vector<8x1xf32>
    tpu.vector_store %arg4[%c0_8, %c0_9], %16 {strides = array<i32>} : memref<8x1xf32, #tpu.memory_space<vmem>>, vector<8x1xf32>,
    return
  }
  func.func @transform_0(%arg0: i32) -> (i32, i32) {
    %c0_i32 = arith.constant 0 : i32
    %c0_i32_0 = arith.constant 0 : i32
    return %arg0, %c0_i32 : i32, i32
  }
  func.func @transform_1(%arg0: i32) -> (i32, i32) {
    %c0_i32 = arith.constant 0 : i32
    %c0_i32_0 = arith.constant 0 : i32
    %c0_i32_1 = arith.constant 0 : i32
    return %c0_i32, %c0_i32_0 : i32, i32
  }
  func.func @transform_2(%arg0: i32) -> (i32, i32) {
    %c0_i32 = arith.constant 0 : i32
    %c0_i32_0 = arith.constant 0 : i32
    %c0_i32_1 = arith.constant 0 : i32
    return %c0_i32, %c0_i32_0 : i32, i32
  }
  func.func @transform_3(%arg0: i32) -> (i32, i32) {
    %c0_i32 = arith.constant 0 : i32
    %c0_i32_0 = arith.constant 0 : i32
    return %arg0, %c0_i32 : i32, i32
  }
}

</mosaic_0001>

<bundles_post_ra>
// kernel: tpu_custom_call.1
= control target key start
LH: loop header
LB: loop body
LE: loop exit
PB: predicated region body
PF: predicated region fallthrough
CT: control target
= control target key end

     0   :  { %vm25_vm0 = vcmask 261120   ;;  %vm36_vm1 = vcmask 7168   ;;  %s112_s0 = inlined_call_operand.vmem [shape: f32[2,32], index: 0, kind: input, shape index: {}]   ;;  %s113_s1 = inlined_call_operand.vmem [shape: f32[1,32], index: 1, kind: input, shape index: {}]   ;;  %s114_s2 = inlined_call_operand.<no memory space> [shape: f32[1,1], index: 2, kind: input, shape index: {}]   ;;  %s115_s3 = inlined_call_operand.vmem [shape: f32[2,1], index: 3, kind: output, shape index: {}]  }
   0x1   :  { %v15_v0 = vld [vmem:[%s112_s0] sm:$0xff]  ;;  %v29_v4 = vstv %s114_s2 }
   0x2   :  { %v77_v1 = vld [vmem:[%s113_s1] ss:$0 sm:$0xff] }
   0x3   :  { %v24_v2 = vmul.f32 %v77_v1, %v15_v0 }
   0x5   :  { %v26_v3 = vsel %vm25_vm0, %v24_v2, 0.0 }
   0x6   :  { %27 = vadd.xlane.f32.xlu0 %v26_v3 }
  0x93   :  { %v28_v5 = vpop.xlane.xlu0 %27 }
  0x94   :  { %v30_v6 = vadd.f32 %v29_v4, %v28_v5 }
  0x96   :  { %v32_v7 = vmul.f32 0.70710677, %v30_v6  ;;  %v31_v9 = vmul.f32 0.5, %v30_v6 }
  0x98   :  { %78 = verf.f32 %v32_v7 }
  0xa2   :  { %v79_v8 = vpop.eup %78 }
  0xa3   :  { %v34_v10 = vadd.f32 1.0, %v79_v8 }
  0xa5   :  { %v35_v11 = vmul.f32 %v34_v10, %v31_v9 }
  0xa7   :  { %37 = vst.msk [vmem:[#allocation3] sm:$0xff] %vm36_vm1, %v35_v11 }
  0xae   :  { %v55_v12 = vld [vmem:[#allocation3] sm:$0x3] }
  0xaf   :  { %56 = vst [vmem:[%s115_s3] sm:$0x3] %v55_v12 }

</bundles_post_ra>
